<compile_context>
chip_gen: v7x
topology: tpu7x:2x2x1
jax: 0.10.0
libtpu: 0.0.40
codegen_flags: <defaults>
</compile_context>

<pallas_src>
import jax
import jax.numpy as jnp
from jax.experimental import pallas as pl
from jax.experimental.pallas import tpu as pltpu


def _round_up(x, m):
    return (x + m - 1) // m * m


def convmlp_kernel(x_ref, w1_ref, b1_ref, w2_ref, b2_ref, o_ref):
    # x_ref:  (Cin, t)   -- pixels on the lane (last) axis
    # w1_ref: (Ch, Cin)  -- fc1 conv weight (kernel_size=1, squeezed), used as-is
    # b1_ref: (Ch, 1)
    # w2_ref: (Cout, Ch) -- fc2 conv weight
    # b2_ref: (Cout, 1)
    # o_ref:  (Cout, t)  -- lane-dense output block
    x = x_ref[...]
    h = jnp.dot(w1_ref[...], x, preferred_element_type=jnp.float32)      # (Ch, t)
    h = jnp.maximum(h + b1_ref[...], 0.0)     # bias + ReLU; norm=Identity, drop=0.0 elided
    o = jnp.dot(w2_ref[...], h, preferred_element_type=jnp.float32)      # (Cout, t)
    o_ref[...] = (o + b2_ref[...]).astype(o_ref.dtype)


def conv_mlp(x_nchw, w1, b1, w2, b2, *, t_px=1024):
    """ConvMlp forward.

    x_nchw: (N, Cin, H, W)
    w1: (Ch, Cin)   fc1 conv weight (1x1 spatial dims squeezed)
    b1: (Ch,)
    w2: (Cout, Ch)  fc2 conv weight
    b2: (Cout,)
    """
    N, Cin, H, W = x_nchw.shape
    Ch = w1.shape[0]
    Cout = w2.shape[0]
    HW = H * W

    # Free (contiguous) reshape: NCHW -> (N, Cin, H*W). No transposes anywhere.
    x3d = x_nchw.reshape(N, Cin, HW)

    # Wide, lane-dense pixel tile; pad the ragged pixel tail if needed.
    t = min(t_px, _round_up(HW, 128))
    t = _round_up(t, 128)
    HW_pad = _round_up(HW, t)
    if HW_pad != HW:
        x3d = jnp.pad(x3d, ((0, 0), (0, 0), (0, HW_pad - HW)))

    b1_2d = b1.reshape(Ch, 1)
    b2_2d = b2.reshape(Cout, 1)

    # VMEM budget: double-buffered x/out tiles + (double-buffered) weights/biases
    # + f32 intermediates. Kept <= 32 MiB so it is safe on v7x's smaller VMEM too.
    elt = jnp.dtype(x3d.dtype).itemsize
    need = (2 * (Cin + Cout) * t * elt
            + 2 * (Ch * Cin + Ch + Cout * Ch + Cout) * 4
            + (Ch + Cout) * t * 4)
    vmem_limit = int(min(max(2 * need, 16 << 20), 32 << 20))

    flops = 2 * N * HW_pad * (Cin * Ch + Ch * Cout)
    bytes_accessed = (x3d.size * elt + N * Cout * HW_pad * elt
                      + (w1.size + b1.size + w2.size + b2.size) * 4)

    grid = (N, HW_pad // t)

    # TODO(synk): for production-size channels (e.g. Cin=512, Ch=2048) the
    # constant-index weight specs double-buffer several MiB each; switch them to
    # resident scratch loaded once (or a lower buffer count) in that regime.
    out3d = pl.pallas_call(
        convmlp_kernel,
        out_shape=jax.ShapeDtypeStruct((N, Cout, HW_pad), x3d.dtype),
        grid_spec=pl.GridSpec(
            grid=grid,
            in_specs=[
                pl.BlockSpec((pl.Squeezed(), Cin, t), lambda n, p: (n, 0, p)),
                pl.BlockSpec((Ch, Cin), lambda n, p: (0, 0)),
                pl.BlockSpec((Ch, 1), lambda n, p: (0, 0)),
                pl.BlockSpec((Cout, Ch), lambda n, p: (0, 0)),
                pl.BlockSpec((Cout, 1), lambda n, p: (0, 0)),
            ],
            out_specs=pl.BlockSpec((pl.Squeezed(), Cout, t),
                                   lambda n, p: (n, 0, p)),
        ),
        compiler_params=pltpu.CompilerParams(
            dimension_semantics=("parallel", "parallel"),
            vmem_limit_bytes=vmem_limit),
        cost_estimate=pl.CostEstimate(
            flops=flops, transcendentals=0, bytes_accessed=bytes_accessed),
    )(x3d, w1, b1_2d, w2, b2_2d)

    # Drop pixel padding; reshape back to NCHW (free, contiguous).
    return out3d[:, :, :HW].reshape(N, Cout, H, W)


if __name__ == "__main__":
    # Module config: in_features=4, hidden_features=32, out_features=4
    N, Cin, H, W = 2, 4, 16, 16
    Ch, Cout = 32, 4

    key = jax.random.PRNGKey(0)
    kx, k1, k2, k3, k4 = jax.random.split(key, 5)

    x = jax.random.normal(kx, (N, Cin, H, W), dtype=jnp.float32)

    # Conv2d(kernel_size=1) weights with the 1x1 spatial dims squeezed:
    # fc1.weight -> (Ch, Cin), fc2.weight -> (Cout, Ch).
    bound1 = 1.0 / (Cin ** 0.5)
    w1 = jax.random.uniform(k1, (Ch, Cin), jnp.float32, -bound1, bound1)
    b1 = jax.random.uniform(k2, (Ch,), jnp.float32, -bound1, bound1)
    bound2 = 1.0 / (Ch ** 0.5)
    w2 = jax.random.uniform(k3, (Cout, Ch), jnp.float32, -bound2, bound2)
    b2 = jax.random.uniform(k4, (Cout,), jnp.float32, -bound2, bound2)

    out = conv_mlp(x, w1, b1, w2, b2)
    jax.block_until_ready(out)

    # Pure-JAX reference (1x1 conv == channel matmul, NCHW kept throughout).
    x3 = x.reshape(N, Cin, H * W)
    ref = jnp.einsum('hc,ncp->nhp', w1, x3) + b1[:, None]
    ref = jnp.maximum(ref, 0.0)
    ref = jnp.einsum('oh,nhp->nop', w2, ref) + b2[:, None]
    ref = ref.reshape(N, Cout, H, W)
    assert jnp.allclose(out, ref, atol=1e-5, rtol=1e-5), "mismatch vs reference"

    print("KERNEL_OK")
</pallas_src>

<mosaic_0001>
module attributes {stable_mosaic.version = 11 : i64} {
  func.func @convmlp_kernel(%arg0: i32, %arg1: i32, %arg2: memref<1x4x256xf32, #tpu.memory_space<vmem>>, %arg3: memref<32x4xf32, #tpu.memory_space<vmem>>, %arg4: memref<32x1xf32, #tpu.memory_space<vmem>>, %arg5: memref<4x32xf32, #tpu.memory_space<vmem>>, %arg6: memref<4x1xf32, #tpu.memory_space<vmem>>, %arg7: memref<1x4x256xf32, #tpu.memory_space<vmem>>) attributes {dimension_semantics = [#tpu.dimension_semantics<parallel>, #tpu.dimension_semantics<parallel>], iteration_bounds = array<i64: 2, 1>, scalar_prefetch = 0 : i64, scratch_operands = 0 : i64, tpu.core_type = #tpu.core_type<tc>, window_params = [{transform_indices = @transform_0, window_bounds = array<i64: 1, 4, 256>}, {pipeline_mode = #tpu.pipeline_mode<synchronous>, transform_indices = @transform_1, window_bounds = array<i64: 32, 4>}, {pipeline_mode = #tpu.pipeline_mode<synchronous>, transform_indices = @transform_2, window_bounds = array<i64: 32, 1>}, {pipeline_mode = #tpu.pipeline_mode<synchronous>, transform_indices = @transform_3, window_bounds = array<i64: 4, 32>}, {pipeline_mode = #tpu.pipeline_mode<synchronous>, transform_indices = @transform_4, window_bounds = array<i64: 4, 1>}, {transform_indices = @transform_5, window_bounds = array<i64: 1, 4, 256>}]} {
    %c0 = arith.constant 0 : index
    %c0_0 = arith.constant 0 : index
    %c0_1 = arith.constant 0 : index
    %0 = vector.load %arg2[%c0, %c0_0, %c0_1] : memref<1x4x256xf32, #tpu.memory_space<vmem>>, vector<1x4x256xf32>
    %1 = vector.shape_cast %0 : vector<1x4x256xf32> to vector<4x256xf32>
    %c0_2 = arith.constant 0 : index
    %c0_3 = arith.constant 0 : index
    %2 = vector.load %arg3[%c0_2, %c0_3] : memref<32x4xf32, #tpu.memory_space<vmem>>, vector<32x4xf32>
    %cst = arith.constant dense<0.000000e+00> : vector<32x256xf32>
    %3 = tpu.matmul %2, %1, %cst {dimension_numbers = #tpu.dot_dimension_numbers<[1], [0], [0], [1], [0, 0, 1, 1], [], []>} : vector<32x4xf32>, vector<4x256xf32>, vector<32x256xf32> -> vector<32x256xf32>
    %c0_4 = arith.constant 0 : index
    %c0_5 = arith.constant 0 : index
    %4 = vector.load %arg4[%c0_4, %c0_5] : memref<32x1xf32, #tpu.memory_space<vmem>>, vector<32x1xf32>
    %5 = vector.broadcast %4 : vector<32x1xf32> to vector<32x256xf32>
    %6 = arith.addf %3, %5 : vector<32x256xf32>
    %cst_6 = arith.constant 0.000000e+00 : f32
    %7 = vector.broadcast %cst_6 : f32 to vector<32x256xf32>
    %8 = arith.maximumf %6, %7 : vector<32x256xf32>
    %c0_7 = arith.constant 0 : index
    %c0_8 = arith.constant 0 : index
    %9 = vector.load %arg5[%c0_7, %c0_8] : memref<4x32xf32, #tpu.memory_space<vmem>>, vector<4x32xf32>
    %cst_9 = arith.constant dense<0.000000e+00> : vector<4x256xf32>
    %10 = tpu.matmul %9, %8, %cst_9 {dimension_numbers = #tpu.dot_dimension_numbers<[1], [0], [0], [1], [0, 0, 1, 1], [], []>} : vector<4x32xf32>, vector<32x256xf32>, vector<4x256xf32> -> vector<4x256xf32>
    %c0_10 = arith.constant 0 : index
    %c0_11 = arith.constant 0 : index
    %11 = vector.load %arg6[%c0_10, %c0_11] : memref<4x1xf32, #tpu.memory_space<vmem>>, vector<4x1xf32>
    %12 = vector.broadcast %11 : vector<4x1xf32> to vector<4x256xf32>
    %13 = arith.addf %10, %12 : vector<4x256xf32>
    %c0_12 = arith.constant 0 : index
    %c0_13 = arith.constant 0 : index
    %c0_14 = arith.constant 0 : index
    %14 = vector.load %arg7[%c0_12, %c0_13, %c0_14] : memref<1x4x256xf32, #tpu.memory_space<vmem>>, vector<1x4x256xf32>
    %15 = vector.shape_cast %14 : vector<1x4x256xf32> to vector<4x256xf32>
    %16 = vector.shape_cast %13 : vector<4x256xf32> to vector<1x4x256xf32>
    tpu.vector_store %arg7[%c0_12, %c0_13, %c0_14], %16 {strides = array<i32>} : memref<1x4x256xf32, #tpu.memory_space<vmem>>, vector<1x4x256xf32>,
    return
  }
  func.func @transform_0(%arg0: i32, %arg1: i32) -> (i32, i32, i32) {
    %c0_i32 = arith.constant 0 : i32
    %c0_i32_0 = arith.constant 0 : i32
    return %arg0, %c0_i32, %arg1 : i32, i32, i32
  }
  func.func @transform_1(%arg0: i32, %arg1: i32) -> (i32, i32) {
    %c0_i32 = arith.constant 0 : i32
    %c0_i32_0 = arith.constant 0 : i32
    %c0_i32_1 = arith.constant 0 : i32
    return %c0_i32, %c0_i32_0 : i32, i32
  }
  func.func @transform_2(%arg0: i32, %arg1: i32) -> (i32, i32) {
    %c0_i32 = arith.constant 0 : i32
    %c0_i32_0 = arith.constant 0 : i32
    %c0_i32_1 = arith.constant 0 : i32
    return %c0_i32, %c0_i32_0 : i32, i32
  }
  func.func @transform_3(%arg0: i32, %arg1: i32) -> (i32, i32) {
    %c0_i32 = arith.constant 0 : i32
    %c0_i32_0 = arith.constant 0 : i32
    %c0_i32_1 = arith.constant 0 : i32
    return %c0_i32, %c0_i32_0 : i32, i32
  }
  func.func @transform_4(%arg0: i32, %arg1: i32) -> (i32, i32) {
    %c0_i32 = arith.constant 0 : i32
    %c0_i32_0 = arith.constant 0 : i32
    %c0_i32_1 = arith.constant 0 : i32
    return %c0_i32, %c0_i32_0 : i32, i32
  }
  func.func @transform_5(%arg0: i32, %arg1: i32) -> (i32, i32, i32) {
    %c0_i32 = arith.constant 0 : i32
    %c0_i32_0 = arith.constant 0 : i32
    return %arg0, %c0_i32, %arg1 : i32, i32, i32
  }
}

</mosaic_0001>

<bundles_post_ra>
// kernel: tpu_custom_call.1
= control target key start
LH: loop header
LB: loop body
LE: loop exit
PB: predicated region body
PF: predicated region fallthrough
CT: control target
= control target key end

     0   :  { %10 = vsyncpa [#allocation3], 0  ;;  %s925_s0 = inlined_call_operand.vmem [shape: f32[2,4,256], index: 0, kind: input, shape index: {}]   ;;  %s926_s1 = inlined_call_operand.vmem [shape: f32[32,4], index: 1, kind: input, shape index: {}]   ;;  %s927_s2 = inlined_call_operand.vmem [shape: f32[32,1], index: 2, kind: input, shape index: {}]   ;;  %s928_s3 = inlined_call_operand.vmem [shape: f32[4,32], index: 3, kind: input, shape index: {}]   ;;  %s929_s4 = inlined_call_operand.vmem [shape: f32[4,1], index: 4, kind: input, shape index: {}]   ;;  %s930_s5 = inlined_call_operand.hbm [shape: f32[2,4,256], index: 5, kind: output, shape index: {}]  }
   0x1   :  { %12 = vsyncpa [#allocation3 + $0x1], 0  ;;  %s783_s18 = smov 0   ;;  %s785_s19 = smov 0  }
   0x2   :  { %s787_s20 = smov 0   ;;  %s789_s21 = smov 0  }
   0x3   :  { %s791_s22 = smov 0   ;;  %s793_s23 = smov 0  }
   0x4 LB: > { %s580_s24 = sadd.s32 4294967295, %s748_s23   ;;  %s581_s25 = sadd.s32 4294967294, %s748_s23   ;;  %s748_s23 = sphi %s793_s23, %s18_s23   ;;  %s744_s22 = sphi %s791_s22, %s937_s22   ;;  %s740_s21 = sphi %s789_s21, %s936_s21   ;;  %s736_s20 = sphi %s787_s20, %s935_s20   ;;  %s732_s19 = sphi %s785_s19, %s934_s19   ;;  %s728_s18 = sphi %s783_s18, %s933_s18  }
   0x5   : > { %s30_s26 = sadd.s32 1, %s744_s22  ;;  %s151_s27 = sadd.s32 1, %s736_s20 }
   0x6   : > { %p32_p0 = scmp.ge.s32.totalorder %s30_s26, 2  ;;  %p161_p1 = scmp.ne.s32.totalorder %s736_s20, %s732_s19 }
   0x7   : > { %p162_p2 = scmp.eq.s32.totalorder %s580_s24, 1  ;;  %p167_p3 = scmp.ne.s32.totalorder %s732_s19, %s728_s18 }
   0x8   : > { %s939_s26 = smov (%p32_p0, %s30_s26), 0  ;;  %p168_p5 = scmp.eq.s32.totalorder %s581_s25, 1 }
   0x9   : > { %p823_p4 = por %p162_p2, %p161_p1  ;;  %s146_s29 = ssub.s32 %s744_s22, %s939_s26 }
   0xa   : > { %p584_p6 = scmp.ge.s32.totalorder %s748_s23, 1  ;;  %p149_p7 = scmp.eq.s32.totalorder %s146_s29, 0 }
   0xb   : > { %p830_p8 = por %p168_p5, %p167_p3  ;;  %p211_p9 = scmp.lt.s32.totalorder %s748_s23, 3 }
   0xc   : > { %s836_s6 = scalar_select %p149_p7, %s736_s20, %s151_s27  }
   0xd   : > { %p212_p10 = pnand %p584_p6, %p211_p9 }
   0xe   : > { %p244_p11 = scmp.lt.s32.totalorder (!%p212_p10), %s740_s21, 1  ;;  %v750_v0 = vmov (!%p212_p10), 0.0   ;;  %v259_v1 = vld [vmem:[%s927_s2] sm:$0xff] (!%p212_p10)  ;;  %v751_v2 = vmov (!%p212_p10), 0   ;;  %v261_v3 = vld [vmem:[%s927_s2 + $0x10] sm:$0xff] (!%p212_p10)  ;;  %v260_v4 = vld [vmem:[%s927_s2 + $0x8] sm:$0xff] (!%p212_p10) }
   0xf   : > { %215 = sbr.rel (%p212_p10) target bundleno = 497 (0x1f1), region = 40  ;;  %367 = vmatprep.mubr.f32.mxu0 (!%p212_p10), %v750_v0  ;;  %475 = vmatprep.mubr.f32.mxu1 (!%p212_p10), %v750_v0  ;;  %v262_v5 = vld [vmem:[%s927_s2 + $0x18] sm:$0xff] (!%p212_p10)  ;;  %vm298_vm0 = vcmask (!%p212_p10), 1043456   ;;  %v255_v8 = vld [vmem:[%s926_s1] sm:$0xff] (!%p212_p10)  ;;  %vm285_vm1 = vcmask (!%p212_p10), 31744   ;;  %v256_v10 = vld [vmem:[%s926_s1 + $0x8] sm:$0xff] (!%p212_p10) }
  0x10   : > { %667 = vset.pattern.permute.xlu0 (!%p212_p10), %v751_v2  ;;  %668 = vset.pattern.permute.xlu1 (!%p212_p10), %v751_v2  ;;  %v401_v9 = vld [vmem:[%s929_s4] sm:$0xf] (!%p212_p10)  ;;  %v257_v11 = vld [vmem:[%s926_s1 + $0x10] sm:$0xff] (!%p212_p10)  ;;  %v258_v12 = vld [vmem:[%s926_s1 + $0x18] sm:$0xff] (!%p212_p10)  ;;  %vm407_vm2 = vcmask (!%p212_p10), 261120   ;;  %s240_s17 = sand.u32 (!%p212_p10), 1, %s732_s19  }
  0x11   : > { %265 = vperm.xlu0 (!%p212_p10), %667, %v259_v1   ;;  %275 = vperm.xlu1 (!%p212_p10), %668, %v261_v3   ;;  %v400_v45 = vld [vmem:[%s928_s3] sm:$0xf] (!%p212_p10)  ;;  %s585_s24 = sshll.u32 (!%p212_p10), %s240_s17, 3  ;;  %s488_s10 = scalar_lea.sflag (!%p212_p10), [#allocation3], %s240_s17 }
  0x12   : > { %s242_s27 = scalar_lea.vmem (!%p212_p10), [#allocation2], %s585_s24 }
  0x13   : > { %s504_s29 = sshll.u32 (!%p212_p10), %s242_s27, 4  ;;  %s880_s29 = int_to_ptr.vmem [resolvable:$true] %s504_s29 }
  0x14   : > { %s670_s11 = scalar_lea.vmem (!%p212_p10), %s880_s29, 128 }
  0x15   : > { %270 = vperm.xlu0 (!%p212_p10), %667, %v260_v4   ;;  %280 = vperm.xlu1 (!%p212_p10), %668, %v262_v5   ;;  %p671_p12 = scmp.ne.s32.totalorder (!%p212_p10), %s880_s29, %s670_s11 }
  0x16   : > { %s245_s9 = scalar_select %p244_p11, %s740_s21, 1 }
  0x17   : > { %p672_p13 = pnand %p671_p12, %p823_p4 }
  0x18   : > { %s600_s12 = sshll.u32 %s245_s9, 3 }
  0x19   : > { %s251_s25 = scalar_lea.vmem %s925_s0, %s600_s12  ;;  %404 = vperm.xlu0 %667, %v401_v9   ;;  %p673_p0 = pneg %p672_p13 }
  0x1a   : > { %v254_v6 = vld [vmem:[%s251_s25] sm:$0xff]  ;;  %s601_s25 = sshll.u32 %s740_s21, 7  ;;  %s752_s21 = smov [#allocation2]  }
  0x1b   : > { %v284_v7 = vcombine.high %v254_v6, %v254_v6  ;;  %s878_s9 = scalar_lea.hbm %s930_s5, %s601_s25  ;;  %s674_s12 = sshll.u32 %s752_s21, 4  ;;  %s675_s12 = int_to_ptr.vmem [resolvable:$false] %s674_s12 }
  0x1c   : > { %s676_s13 = scalar_lea.vmem %s675_s12, 256  ;;  %p677_p1 = scmp.lt.s32.totalorder %s880_s29, %s675_s12 }
  0x1d   : > { %588 = vmatprep.subr.msk.mxu0 %vm298_vm0, %v284_v7  ;;  %p678_p2 = scmp.lt.s32.totalorder %s676_s13, %s670_s11 }
  0x1e   : > { %589 = vmatpush1.msk.msra.mxu0 %vm298_vm0, %v254_v6 }
  0x1f   : > { %590 = vmatmul.mubr.msk.f32.vlgmr.msra.gmra.mrb[0].mxu0 %vm285_vm1, %v255_v8  ;;  %p679_p3 = por %p678_p2, %p677_p1 }
  0x20   : > { %373 = vmatprep.mubr.f32.mxu0 %v750_v0 }
  0x21   : > { %p680_p5 = pnand %p679_p3, %p673_p0 }
  0x23   : > { %591 = vmatmul.mubr.msk.f32.gmra.mrb[2].mxu0 %vm285_vm1, %v256_v10 }
  0x24   : > { %379 = vmatprep.mubr.f32.mxu0 %v750_v0 }
  0x27   : > { %592 = vmatmul.mubr.msk.f32.gmra.mrb[4].mxu0 %vm285_vm1, %v257_v11 }
  0x28   : > { %385 = vmatprep.mubr.f32.mxu0 %v750_v0 }
  0x2b   : > { %593 = vmatmul.mubr.msk.f32.gmra.mrb[6].mxu0 %vm285_vm1, %v258_v12 }
  0x90   : > { %v266_v13 = vpop.permute.xlu0 %265  ;;  %v276_v22 = vpop.permute.xlu1 %275 }
  0x94   : > { %v271_v17 = vpop.permute.xlu0 %270  ;;  %v281_v33 = vpop.permute.xlu1 %280 }
  0x98   : > { %v405_v46 = vpop.permute.xlu0 %404 }
  0xf2   : > { %v369_v14 = vpop.f32.mrb[0].mxu0 }
  0xf3   : > { %v371_v15 = vpop.f32.mrb[1].mxu0  ;;  %v370_v16 = vadd.f32 %v369_v14, %v266_v13 }
  0xf4   : > { %v372_v18 = vadd.f32 %v371_v15, %v266_v13 }
  0xf5   : > { %v392_v24 = vmax.f32 %v370_v16, 0.0 }
  0xf6   : > { %v375_v19 = vpop.f32.mrb[2].mxu0  ;;  %v393_v26 = vmax.f32 %v372_v18, 0.0 }
  0xf7   : > { %v376_v20 = vadd.f32 %v375_v19, %v271_v17  ;;  %v377_v21 = vpop.f32.mrb[3].mxu0 }
  0xf8   : > { %v378_v23 = vadd.f32 %v377_v21, %v271_v17 }
  0xf9   : > { %v394_v25 = vmax.f32 %v376_v20, 0.0 }
  0xfa   : > { %v395_v27 = vmax.f32 %v378_v23, 0.0  ;;  %v381_v28 = vpop.f32.mrb[4].mxu0 }
  0xfb   : > { %v383_v29 = vpop.f32.mrb[5].mxu0  ;;  %v604_v30 = vpack.c.bf16 %v394_v25, %v392_v24  ;;  %v382_v32 = vadd.f32 %v381_v28, %v276_v22 }
  0xfc   : > { %v602_v31 = vpack.c.bf16 %v395_v27, %v393_v26  ;;  %v384_v34 = vadd.f32 %v383_v29, %v276_v22 }
  0xfd   : > { %v396_v39 = vmax.f32 %v382_v32, 0.0 }
  0xfe   : > { %v387_v35 = vpop.f32.mrb[6].mxu0  ;;  %603 = vmatprep.subr.bf16.mxu1 %v602_v31  ;;  %v397_v41 = vmax.f32 %v384_v34, 0.0 }
  0xff   : > { %v388_v36 = vadd.f32 %v387_v35, %v281_v33  ;;  %v389_v37 = vpop.f32.mrb[7].mxu0  ;;  %605 = vmatpush1.bf16.msra.mxu1 %v604_v30 }
 0x100   : > { %v390_v38 = vadd.f32 %v389_v37, %v281_v33 }
 0x101   : > { %v398_v40 = vmax.f32 %v388_v36, 0.0 }
 0x102   : > { %v399_v42 = vmax.f32 %v390_v38, 0.0 }
 0x103   : > { %v608_v43 = vpack.c.bf16 %v398_v40, %v396_v39 }
 0x104   : > { %v606_v44 = vpack.c.bf16 %v399_v42, %v397_v41 }
 0x106   : > { %607 = vmatprep.subr.bf16.mxu1 %v606_v44 }
 0x107   : > { %609 = vmatpush1.bf16.msra.mxu1 %v608_v43 }
 0x10a   : > { %594 = vmatmul.mubr.msk.f32.vlgmr.msra.gmra.mrb[0].mxu1 %vm407_vm2, %v400_v45 }
 0x1dd   : > { %v477_v47 = vpop.f32.mrb[0].mxu1 }
 0x1de   : > { %v478_v48 = vadd.f32 %v477_v47, %v405_v46  ;;  %v479_v49 = vpop.f32.mrb[1].mxu1 }
 0x1df   : > { %v480_v50 = vadd.f32 %v479_v49, %v405_v46 }
 0x1e1   : > { %v484_v51 = vcombine.low %v478_v48, %v480_v50 }
 0x1e3   : > { %486 = vst [vmem:[%s242_s27] sm:$0xff] %v484_v51 }
 0x1e4   : > { %683 = shalt.err (!%p680_p5)
}
 0x1e5   : > { %s684_s14 = scalar_lea.hbm %s878_s9, 128  ;;  %s688_s17 = scalar_lea.hbm %s930_s5, 256 }
 0x1e6   : > { %p685_p6 = scmp.ne.s32.totalorder %s878_s9, %s684_s14  ;;  %p689_p10 = scmp.lt.u32.totalorder %s878_s9, %s930_s5 }
 0x1e7   : > { %p690_p11 = scmp.lt.u32.totalorder %s688_s17, %s684_s14  ;;  %p692_p13 = scmp.lt.u32.totalorder %s684_s14, %s878_s9 }
 0x1e8   : > { %p686_p7 = pnand %p685_p6, %p823_p4 }
 0x1e9   : > { %p691_p12 = por %p690_p11, %p689_p10 }
 0x1ea   : > { %p687_p9 = pneg %p686_p7 }
 0x1eb   : > { %p693_p0 = por %p692_p13, %p691_p12 }
 0x1ed   : > { %p694_p1 = pnand %p693_p0, %p687_p9 }
 0x1ef   : > { %697 = shalt.err (!%p694_p1)
}
 0x1f0   : > { %610 = dma.vmem_to_hbm [thread:$0]  (%p823_p4), %s880_s29, 128, %s878_s9, %s488_s10  }
 0x1f1 PF: > { %p616_p2 = scmp.ge.s32.totalorder %s748_s23, 2  ;;  %s516_s27 = sand.u32 1, %s728_s18  }
 0x1f2   : > { %s517_s7 = scalar_lea.sflag [#allocation3], %s516_s27 }
 0x1f3   : > { %p613_p3 = pnand %p616_p2, %p830_p8 }
 0x1f5   : > { %723 = dma.done.wait (!%p613_p3), %s517_s7, 128  }
 0x1f6   : > { %725 = vsyncadd (!%p613_p3), %s517_s7, 4294967168  ;;  %s18_s23 = sadd.s32 1, %s748_s23   ;;  %s933_s18 = smov %s732_s19 }
 0x1f7   : > { %p15_p5 = scmp.ge.s32.totalorder %s18_s23, 4   ;;  %s934_s19 = smov %s736_s20 }
 0x1f8   : > { %s935_s20 = smov %s836_s6  ;;  %s936_s21 = smov %s744_s22 }
 0x1f9   : > { %s937_s22 = smov %s939_s26  ;;  %17 = sbr.rel (!%p15_p5) target bundleno = 4 (0x4), region = 75 }
 0x200   :  { %522 = vsyncpa [#allocation3], 1 }
 0x201   :  { %524 = vsyncpa [#allocation3 + $0x1], 1 }

</bundles_post_ra>
